<compile_context>
chip_gen: v5e
topology: v5e:2x2
jax: 0.10.0
libtpu: 0.0.40
codegen_flags: <defaults>
</compile_context>

<pallas_src>
import math
from functools import partial

import jax
import jax.numpy as jnp
from jax.experimental import pallas as pl
from jax.experimental.pallas import tpu as pltpu


def _focal_loss_kernel(logits_ref, target_ref, *rest, gamma, size_average,
                       total_rows, hw, tile_hw, use_alpha):
    if use_alpha:
        alpha_ref, out_ref, acc_ref = rest
    else:
        alpha_ref = None
        out_ref, acc_ref = rest

    n = pl.program_id(0)
    j = pl.program_id(1)

    @pl.when(jnp.logical_and(n == 0, j == 0))
    def _():
        acc_ref[...] = jnp.zeros_like(acc_ref)

    x = logits_ref[...].astype(jnp.float32)            # (C, T): classes on sublanes
    tgt = target_ref[...]                              # (1, T) int32
    C, T = x.shape

    # Mask columns past the true spatial extent (partial last block) and zero
    # their logits so garbage never produces NaN/Inf in the sums.
    col = j * tile_hw + jax.lax.broadcasted_iota(jnp.int32, (1, T), 1)
    valid = col < hw                                   # (1, T)
    x = jnp.where(valid, x, 0.0)

    # Numerically stable softmax pieces over the class (sublane) axis.
    cmax = jnp.max(x, axis=0, keepdims=True)           # (1, T)
    shifted = x - cmax                                 # (C, T)
    ex = jnp.exp(shifted)                              # (C, T): C EUP exps / column
    sum_ex = jnp.sum(ex, axis=0, keepdims=True)        # (1, T)

    # gather(1, target): one-hot select along the class axis.
    cls = jax.lax.broadcasted_iota(jnp.int32, (C, T), 0)
    hit = cls == tgt                                   # (C, T)

    sh_t = jnp.sum(jnp.where(hit, shifted, 0.0), axis=0, keepdims=True)  # (1, T)
    ex_t = jnp.sum(jnp.where(hit, ex, 0.0), axis=0, keepdims=True)       # (1, T)

    logpt = sh_t - jnp.log(sum_ex)                     # log_softmax at target class
    pt = ex_t / sum_ex                                 # reuse exp(shifted): no extra exp

    if use_alpha:
        at = jnp.sum(jnp.where(hit, alpha_ref[...], 0.0), axis=0, keepdims=True)
        logpt = logpt * at

    one_m_pt = 1.0 - pt
    g = float(gamma)
    if g == 0.0:                                       # no pow at all
        loss = -logpt
    elif g.is_integer() and g > 0:                     # integer gamma -> multiplies
        w = one_m_pt
        for _ in range(int(g) - 1):
            w = w * one_m_pt
        loss = -w * logpt
    else:                                              # generic float gamma
        loss = -(one_m_pt ** g) * logpt

    # Lane-dense partial sums; no per-step cross-lane reduce / scalar store.
    acc_ref[...] += jnp.where(valid, loss, 0.0)

    @pl.when(jnp.logical_and(n == pl.num_programs(0) - 1,
                             j == pl.num_programs(1) - 1))
    def _():
        total = jnp.sum(acc_ref[...], keepdims=True)   # single reduce at the end
        if size_average:
            total = total / total_rows
        out_ref[...] = total


def _pick_tile_hw(hw, c, itemsize):
    """Largest lane-dense tile whose double-buffered stream + f32 temporaries
    stay comfortably inside scoped VMEM on every generation (incl. v7x)."""
    if hw % 128 != 0:
        return hw                       # full-extent block satisfies layout rules
    budget = 8 * 1024 * 1024            # per-block byte budget (lots of headroom)
    per_col = c * (2 * itemsize + 8 * 4) + 16   # 2x-buffered input + f32 temps + tgt/acc
    t = max(128, (budget // per_col) // 128 * 128)
    return int(min(t, hw, 8192))


def focal_loss(x, target, *, gamma=0.0, alpha=None, size_average=True,
               tile_hw=None):
    """Matches FocalLoss.forward. x: (N, C, *spatial) or (M, C) logits (f32 or
    bf16 - upcast happens in-kernel); target: integer class indices. Scalar."""
    x = jnp.asarray(x)
    target = jnp.asarray(target)

    if x.ndim > 2:
        N, C = int(x.shape[0]), int(x.shape[1])
        HW = int(math.prod(x.shape[2:]))
        x3 = x.reshape(N, C, HW)                       # free reshape, no transpose
        t3 = target.reshape(N, 1, HW).astype(jnp.int32)
    else:
        M, C = int(x.shape[0]), int(x.shape[1])
        N, HW = 1, M
        x3 = x.T.reshape(1, C, M)                      # classes onto sublanes
        t3 = target.reshape(1, 1, M).astype(jnp.int32)

    use_alpha = alpha is not None
    if use_alpha:
        if isinstance(alpha, (float, int)) and not isinstance(alpha, bool):
            alpha_arr = jnp.array([alpha, 1.0 - alpha], jnp.float32)
        else:
            alpha_arr = jnp.asarray(alpha, jnp.float32).reshape(-1)
        assert alpha_arr.shape[0] == C, "alpha must have one weight per class"
        alpha_arr = alpha_arr.reshape(C, 1)

    if tile_hw is None:
        tile = _pick_tile_hw(HW, C, x3.dtype.itemsize)
    else:
        tile = int(tile_hw)
        assert tile == HW or tile % 128 == 0, "tile_hw must be HW or a multiple of 128"

    grid = (N, pl.cdiv(HW, tile))

    in_specs = [
        pl.BlockSpec((None, C, tile), lambda n, j: (n, 0, j)),   # logits (NCHW-native)
        pl.BlockSpec((None, 1, tile), lambda n, j: (n, 0, j)),   # targets (lane-dense)
    ]
    args = [x3, t3]
    if use_alpha:
        in_specs.append(pl.BlockSpec((C, 1), lambda n, j: (0, 0)))  # resident alpha
        args.append(alpha_arr)

    kernel = partial(_focal_loss_kernel, gamma=float(gamma),
                     size_average=bool(size_average),
                     total_rows=float(N * HW), hw=int(HW), tile_hw=int(tile),
                     use_alpha=use_alpha)

    # TODO(synk): on v7x the row stream could additionally be split across the
    # two TensorCores via per-core partial outputs; kept single-core here since
    # the shared accumulator requires sequential ("arbitrary") grid semantics.
    out = pl.pallas_call(
        kernel,
        out_shape=jax.ShapeDtypeStruct((1, 1), jnp.float32),
        grid_spec=pltpu.PrefetchScalarGridSpec(
            num_scalar_prefetch=0,
            grid=grid,
            in_specs=in_specs,
            out_specs=pl.BlockSpec((1, 1), lambda n, j: (0, 0)),
            scratch_shapes=[pltpu.VMEM((1, tile), jnp.float32)],
        ),
        compiler_params=pltpu.CompilerParams(
            dimension_semantics=("arbitrary", "arbitrary"),
            vmem_limit_bytes=32 * 1024 * 1024),
    )(*args)
    return out[0, 0]


def _reference(x, target, gamma, alpha, size_average=True):
    x = jnp.asarray(x, jnp.float32)
    if x.ndim > 2:
        N, C = x.shape[0], x.shape[1]
        logits = jnp.moveaxis(x.reshape(N, C, -1), 1, 2).reshape(-1, C)
    else:
        logits = x
    tgt = jnp.asarray(target).reshape(-1)
    logsm = jax.nn.log_softmax(logits, axis=1)
    logpt = jnp.take_along_axis(logsm, tgt[:, None], axis=1)[:, 0]
    pt = jnp.exp(logpt)
    if alpha is not None:
        if isinstance(alpha, (float, int)) and not isinstance(alpha, bool):
            alpha = jnp.array([alpha, 1.0 - alpha], jnp.float32)
        logpt = logpt * jnp.asarray(alpha, jnp.float32)[tgt]
    loss = -1.0 * (1.0 - pt) ** gamma * logpt
    return loss.mean() if size_average else loss.sum()


if __name__ == "__main__":
    key = jax.random.PRNGKey(0)
    k1, k2, k3, k4, k5, k6 = jax.random.split(key, 6)

    # Case 1: NCHW logits, per-class alpha, gamma=2 (integer fast path), mean.
    N, C, H, W = 2, 4, 16, 16
    alpha = jnp.array([0.25, 0.5, 0.75, 1.0], jnp.float32)
    x1 = jax.random.normal(k1, (N, C, H, W), jnp.float32)
    t1 = jax.random.randint(k2, (N, H, W), 0, C, jnp.int32)
    got1 = jax.block_until_ready(
        focal_loss(x1, t1, gamma=2.0, alpha=alpha, size_average=True))
    ref1 = _reference(x1, t1, 2.0, alpha, True)
    assert jnp.allclose(got1, ref1, rtol=1e-5, atol=1e-5), (got1, ref1)

    # Case 2: no alpha, gamma=0, sum reduction.
    got2 = jax.block_until_ready(
        focal_loss(x1, t1, gamma=0.0, alpha=None, size_average=False))
    ref2 = _reference(x1, t1, 0.0, None, False)
    assert jnp.allclose(got2, ref2, rtol=1e-5, atol=1e-5), (got2, ref2)

    # Case 3: spatial size not a multiple of 128 (full-extent block fallback),
    # non-integer gamma (generic pow path).
    x3 = jax.random.normal(k3, (2, 4, 10, 10), jnp.float32)
    t3 = jax.random.randint(k4, (2, 10, 10), 0, 4, jnp.int32)
    got3 = jax.block_until_ready(
        focal_loss(x3, t3, gamma=1.5, alpha=None, size_average=True))
    ref3 = _reference(x3, t3, 1.5, None, True)
    assert jnp.allclose(got3, ref3, rtol=1e-5, atol=1e-5), (got3, ref3)

    # Case 4: partial last tile (HW=384, explicit 256-column tile) exercises
    # the in-kernel padding mask.
    x4 = jax.random.normal(k5, (1, 4, 384), jnp.float32)
    t4 = jax.random.randint(k6, (1, 384), 0, 4, jnp.int32)
    got4 = jax.block_until_ready(
        focal_loss(x4, t4, gamma=2.0, alpha=None, size_average=False,
                   tile_hw=256))
    ref4 = _reference(x4, t4, 2.0, None, False)
    assert jnp.allclose(got4, ref4, rtol=1e-5, atol=1e-5), (got4, ref4)

    print("KERNEL_OK")
</pallas_src>

<mosaic_0001>
module attributes {stable_mosaic.version = 11 : i64} {
  func.func @_focal_loss_kernel(%arg0: i32, %arg1: i32, %arg2: memref<1x4x256xf32, #tpu.memory_space<vmem>>, %arg3: memref<1x1x256xi32, #tpu.memory_space<vmem>>, %arg4: memref<4x1xf32, #tpu.memory_space<vmem>>, %arg5: memref<1x1xf32, #tpu.memory_space<vmem>>, %arg6: memref<1x256xf32, #tpu.memory_space<vmem>>) attributes {dimension_semantics = [#tpu.dimension_semantics<arbitrary>, #tpu.dimension_semantics<arbitrary>], iteration_bounds = array<i64: 2, 1>, scalar_prefetch = 0 : i64, scratch_operands = 1 : i64, tpu.core_type = #tpu.core_type<tc>, window_params = [{transform_indices = @transform_0, window_bounds = array<i64: 1, 4, 256>}, {transform_indices = @transform_1, window_bounds = array<i64: 1, 1, 256>}, {pipeline_mode = #tpu.pipeline_mode<synchronous>, transform_indices = @transform_2, window_bounds = array<i64: 4, 1>}, {pipeline_mode = #tpu.pipeline_mode<synchronous>, transform_indices = @transform_3, window_bounds = array<i64: 1, 1>}]} {
    %c0_i32 = arith.constant 0 : i32
    %0 = arith.cmpi eq, %arg0, %c0_i32 : i32
    %c0_i32_0 = arith.constant 0 : i32
    %1 = arith.cmpi eq, %arg1, %c0_i32_0 : i32
    %2 = arith.andi %0, %1 : i1
    %3 = arith.extui %2 : i1 to i32
    %c0_i32_1 = arith.constant 0 : i32
    %4 = arith.cmpi ne, %3, %c0_i32_1 : i32
    scf.if %4 {
      %cst_27 = arith.constant 0.000000e+00 : f32
      %64 = vector.broadcast %cst_27 : f32 to vector<1x256xf32>
      %c0_28 = arith.constant 0 : index
      %c0_29 = arith.constant 0 : index
      %65 = vector.load %arg6[%c0_28, %c0_29] : memref<1x256xf32, #tpu.memory_space<vmem>>, vector<1x256xf32>
      tpu.vector_store %arg6[%c0_28, %c0_29], %64 {strides = array<i32>} : memref<1x256xf32, #tpu.memory_space<vmem>>, vector<1x256xf32>,
    } else {
    }
    %c0 = arith.constant 0 : index
    %c0_2 = arith.constant 0 : index
    %c0_3 = arith.constant 0 : index
    %5 = vector.load %arg2[%c0, %c0_2, %c0_3] : memref<1x4x256xf32, #tpu.memory_space<vmem>>, vector<1x4x256xf32>
    %6 = vector.shape_cast %5 : vector<1x4x256xf32> to vector<4x256xf32>
    %c0_4 = arith.constant 0 : index
    %c0_5 = arith.constant 0 : index
    %c0_6 = arith.constant 0 : index
    %7 = vector.load %arg3[%c0_4, %c0_5, %c0_6] : memref<1x1x256xi32, #tpu.memory_space<vmem>>, vector<1x1x256xi32>
    %8 = vector.shape_cast %7 : vector<1x1x256xi32> to vector<1x256xi32>
    %c256_i32 = arith.constant 256 : i32
    %9 = arith.muli %arg1, %c256_i32 : i32
    %10 = tpu.iota {dimensions = array<i32: 1>} : vector<1x256xi32>
    %11 = vector.broadcast %9 : i32 to vector<1x256xi32>
    %12 = arith.addi %11, %10 : vector<1x256xi32>
    %c256_i32_7 = arith.constant 256 : i32
    %13 = vector.broadcast %c256_i32_7 : i32 to vector<1x256xi32>
    %14 = arith.cmpi slt, %12, %13 : vector<1x256xi32>
    %cst = arith.constant 0.000000e+00 : f32
    %15 = vector.shape_cast %14 : vector<1x256xi1> to vector<1x256xi1>
    %16 = vector.broadcast %15 : vector<1x256xi1> to vector<4x256xi1>
    %17 = vector.broadcast %cst : f32 to vector<4x256xf32>
    %18 = arith.select %16, %6, %17 : vector<4x256xi1>, vector<4x256xf32>
    %cst_8 = arith.constant dense<0xFF800000> : vector<256xf32>
    %19 = vector.multi_reduction <maximumf>, %18, %cst_8 [0] : vector<4x256xf32> to vector<256xf32>
    %20 = vector.shape_cast %19 : vector<256xf32> to vector<1x256xf32>
    %21 = vector.broadcast %20 : vector<1x256xf32> to vector<4x256xf32>
    %22 = arith.subf %18, %21 : vector<4x256xf32>
    %23 = math.exp %22 : vector<4x256xf32>
    %cst_9 = arith.constant dense<0.000000e+00> : vector<256xf32>
    %24 = vector.multi_reduction <add>, %23, %cst_9 [0] : vector<4x256xf32> to vector<256xf32>
    %25 = vector.shape_cast %24 : vector<256xf32> to vector<1x256xf32>
    %26 = tpu.iota {dimensions = array<i32: 0>} : vector<4x256xi32>
    %27 = vector.broadcast %8 : vector<1x256xi32> to vector<4x256xi32>
    %28 = arith.cmpi eq, %26, %27 : vector<4x256xi32>
    %cst_10 = arith.constant 0.000000e+00 : f32
    %29 = vector.broadcast %cst_10 : f32 to vector<4x256xf32>
    %30 = arith.select %28, %22, %29 : vector<4x256xi1>, vector<4x256xf32>
    %cst_11 = arith.constant dense<0.000000e+00> : vector<256xf32>
    %31 = vector.multi_reduction <add>, %30, %cst_11 [0] : vector<4x256xf32> to vector<256xf32>
    %32 = vector.shape_cast %31 : vector<256xf32> to vector<1x256xf32>
    %cst_12 = arith.constant 0.000000e+00 : f32
    %33 = vector.broadcast %cst_12 : f32 to vector<4x256xf32>
    %34 = arith.select %28, %23, %33 : vector<4x256xi1>, vector<4x256xf32>
    %cst_13 = arith.constant dense<0.000000e+00> : vector<256xf32>
    %35 = vector.multi_reduction <add>, %34, %cst_13 [0] : vector<4x256xf32> to vector<256xf32>
    %36 = vector.shape_cast %35 : vector<256xf32> to vector<1x256xf32>
    %37 = math.log %25 : vector<1x256xf32>
    %38 = arith.subf %32, %37 : vector<1x256xf32>
    %39 = arith.divf %36, %25 : vector<1x256xf32>
    %c0_14 = arith.constant 0 : index
    %c0_15 = arith.constant 0 : index
    %40 = vector.load %arg4[%c0_14, %c0_15] : memref<4x1xf32, #tpu.memory_space<vmem>>, vector<4x1xf32>
    %cst_16 = arith.constant 0.000000e+00 : f32
    %41 = vector.shape_cast %40 : vector<4x1xf32> to vector<4x1xf32>
    %42 = vector.broadcast %41 : vector<4x1xf32> to vector<4x256xf32>
    %43 = vector.broadcast %cst_16 : f32 to vector<4x256xf32>
    %44 = arith.select %28, %42, %43 : vector<4x256xi1>, vector<4x256xf32>
    %cst_17 = arith.constant dense<0.000000e+00> : vector<256xf32>
    %45 = vector.multi_reduction <add>, %44, %cst_17 [0] : vector<4x256xf32> to vector<256xf32>
    %46 = vector.shape_cast %45 : vector<256xf32> to vector<1x256xf32>
    %47 = arith.mulf %38, %46 : vector<1x256xf32>
    %cst_18 = arith.constant 1.000000e+00 : f32
    %48 = vector.broadcast %cst_18 : f32 to vector<1x256xf32>
    %49 = arith.subf %48, %39 : vector<1x256xf32>
    %50 = arith.mulf %49, %49 : vector<1x256xf32>
    %cst_19 = arith.constant 0.000000e+00 : f32
    %51 = vector.broadcast %cst_19 : f32 to vector<1x256xf32>
    %52 = arith.subf %51, %50 : vector<1x256xf32>
    %53 = arith.mulf %52, %47 : vector<1x256xf32>
    %c0_20 = arith.constant 0 : index
    %c0_21 = arith.constant 0 : index
    %54 = vector.load %arg6[%c0_20, %c0_21] : memref<1x256xf32, #tpu.memory_space<vmem>>, vector<1x256xf32>
    %cst_22 = arith.constant 0.000000e+00 : f32
    %55 = vector.broadcast %cst_22 : f32 to vector<1x256xf32>
    %56 = arith.select %14, %53, %55 : vector<1x256xi1>, vector<1x256xf32>
    %57 = arith.addf %54, %56 : vector<1x256xf32>
    %c0_23 = arith.constant 0 : index
    %c0_24 = arith.constant 0 : index
    %58 = vector.load %arg6[%c0_23, %c0_24] : memref<1x256xf32, #tpu.memory_space<vmem>>, vector<1x256xf32>
    tpu.vector_store %arg6[%c0_23, %c0_24], %57 {strides = array<i32>} : memref<1x256xf32, #tpu.memory_space<vmem>>, vector<1x256xf32>,
    %c1_i32 = arith.constant 1 : i32
    %59 = arith.cmpi eq, %arg0, %c1_i32 : i32
    %c0_i32_25 = arith.constant 0 : i32
    %60 = arith.cmpi eq, %arg1, %c0_i32_25 : i32
    %61 = arith.andi %59, %60 : i1
    %62 = arith.extui %61 : i1 to i32
    %c0_i32_26 = arith.constant 0 : i32
    %63 = arith.cmpi ne, %62, %c0_i32_26 : i32
    scf.if %63 {
      %c0_27 = arith.constant 0 : index
      %c0_28 = arith.constant 0 : index
      %64 = vector.load %arg6[%c0_27, %c0_28] : memref<1x256xf32, #tpu.memory_space<vmem>>, vector<1x256xf32>
      %65 = vector.shape_cast %64 : vector<1x256xf32> to vector<1x1x256xf32>
      %cst_29 = arith.constant dense<0.000000e+00> : vector<1xf32>
      %66 = vector.multi_reduction <add>, %65, %cst_29 [1, 2] : vector<1x1x256xf32> to vector<1xf32>
      %67 = vector.shape_cast %66 : vector<1xf32> to vector<1x1x1xf32>
      %68 = vector.extract %67[0, 0, 0] : f32 from vector<1x1x1xf32>
      %69 = vector.broadcast %68 : f32 to vector<1x1xf32>
      %cst_30 = arith.constant 5.120000e+02 : f32
      %70 = vector.broadcast %cst_30 : f32 to vector<1x1xf32>
      %71 = arith.divf %69, %70 : vector<1x1xf32>
      %c0_31 = arith.constant 0 : index
      %c0_32 = arith.constant 0 : index
      %72 = vector.load %arg5[%c0_31, %c0_32] : memref<1x1xf32, #tpu.memory_space<vmem>>, vector<1x1xf32>
      tpu.vector_store %arg5[%c0_31, %c0_32], %71 {strides = array<i32>} : memref<1x1xf32, #tpu.memory_space<vmem>>, vector<1x1xf32>,
    } else {
    }
    return
  }
  func.func @transform_0(%arg0: i32, %arg1: i32) -> (i32, i32, i32) {
    %c0_i32 = arith.constant 0 : i32
    %c0_i32_0 = arith.constant 0 : i32
    return %arg0, %c0_i32, %arg1 : i32, i32, i32
  }
  func.func @transform_1(%arg0: i32, %arg1: i32) -> (i32, i32, i32) {
    %c0_i32 = arith.constant 0 : i32
    %c0_i32_0 = arith.constant 0 : i32
    return %arg0, %c0_i32, %arg1 : i32, i32, i32
  }
  func.func @transform_2(%arg0: i32, %arg1: i32) -> (i32, i32) {
    %c0_i32 = arith.constant 0 : i32
    %c0_i32_0 = arith.constant 0 : i32
    %c0_i32_1 = arith.constant 0 : i32
    return %c0_i32, %c0_i32_0 : i32, i32
  }
  func.func @transform_3(%arg0: i32, %arg1: i32) -> (i32, i32) {
    %c0_i32 = arith.constant 0 : i32
    %c0_i32_0 = arith.constant 0 : i32
    %c0_i32_1 = arith.constant 0 : i32
    return %c0_i32, %c0_i32_0 : i32, i32
  }
}

</mosaic_0001>

<bundles_post_ra>
// kernel: tpu_custom_call.1
= control target key start
LH: loop header
LB: loop body
LE: loop exit
PB: predicated region body
PF: predicated region fallthrough
CT: control target
= control target key end

     0   :  { %8 = vsyncpa [#allocation4], 0  ;;  %s924_s0 = inlined_call_operand.hbm [shape: f32[2,4,256], index: 0, kind: input, shape index: {}]   ;;  %s925_s1 = inlined_call_operand.vmem [shape: s32[2,1,256], index: 1, kind: input, shape index: {}]   ;;  %s926_s2 = inlined_call_operand.vmem [shape: f32[4,1], index: 2, kind: input, shape index: {}]   ;;  %s927_s3 = inlined_call_operand.hbm [shape: f32[1,1], index: 3, kind: output, shape index: {}]  }
   0x1   :  { %10 = vsyncpa [#allocation4 + $0x1], 0 }
   0x2   :  { %11 = vsyncpa [#allocation5], 0  ;;  %s775_s12 = smov 0   ;;  %s777_s13 = smov 0  }
   0x3   :  { %s779_s14 = smov 0   ;;  %s781_s15 = smov 0  }
   0x4   :  { %s783_s16 = smov 0   ;;  %s785_s17 = smov 0  }
   0x5 LB: > { %s537_s18 = sadd.s32 4294967295, %s749_s17   ;;  %s29_s19 = sadd.s32 1, %s745_s16  ;;  %s749_s17 = sphi %s785_s17, %s17_s17   ;;  %s745_s16 = sphi %s783_s16, %s942_s16   ;;  %s741_s15 = sphi %s781_s15, %s941_s15   ;;  %s737_s14 = sphi %s779_s14, %s940_s14   ;;  %s733_s13 = sphi %s777_s13, %s939_s13   ;;  %s729_s12 = sphi %s775_s12, %s938_s12  }
   0x6   : > { %p31_p0 = scmp.ge.s32.totalorder %s29_s19, 2  ;;  %s38_s20 = sadd.s32 1, %s737_s14 }
   0x7   : > { %p45_p1 = scmp.ne.s32.totalorder %s737_s14, %s733_s13  ;;  %p46_p2 = scmp.eq.s32.totalorder %s749_s17, 0 }
   0x8   : > { %s944_s19 = smov (%p31_p0, %s29_s19), 0  ;;  %p51_p4 = scmp.ne.s32.totalorder %s733_s13, %s729_s12 }
   0x9   : > { %p811_p3 = por %p46_p2, %p45_p1  ;;  %s33_s22 = ssub.s32 %s745_s16, %s944_s19 }
   0xa   : > { %p52_p5 = scmp.eq.s32.totalorder %s537_s18, 0  ;;  %p36_p6 = scmp.eq.s32.totalorder %s33_s22, 0 }
   0xb   : > { %p567_p8 = scmp.lt.s32.totalorder %s749_s17, 2  ;;  %s148_s25 = sand.u32 1, %s737_s14  }
   0xc   : > { %p820_p7 = por %p52_p5, %p51_p4  ;;  %s552_s26 = sshll.u32 %s745_s16, 3 }
   0xd   : > { %s826_s24 = scalar_select %p36_p6, %s737_s14, %s38_s20  }
   0xe   : > { %s540_s27 = sshll.u32 %s148_s25, 3  ;;  %s159_s30 = scalar_lea.hbm %s924_s0, %s552_s26 }
   0xf   : > { %s161_s4 = sshll.u32 %s159_s30, 4  ;;  %s152_s5 = scalar_lea.vmem [#allocation3], %s540_s27  ;;  %s162_s4 = int_to_ptr.hbm [resolvable:$true] %s161_s4 }
  0x10   : > { %s163_s6 = sshll.u32 %s152_s5, 4  ;;  %p564_p9 = pnand %p567_p8, %p811_p3  ;;  %s164_s6 = int_to_ptr.vmem [resolvable:$true] %s163_s6 }
  0x11   : > { %p543_p10 = scmp.ge.s32.totalorder %s749_s17, 1  ;;  %p180_p11 = scmp.lt.s32.totalorder %s749_s17, 3 }
  0x12   : > { %s149_s7 = scalar_lea.sflag [#allocation4], %s148_s25 }
  0x13   : > { %566 = dma.hbm_to_vmem [thread:$0]  (!%p564_p9), %s162_s4, 128, %s164_s6, %s149_s7  }
  0x14   : > { %p181_p12 = pnand %p543_p10, %p180_p11 }
  0x15   : > { %s186_s8 = sand.u32 (!%p181_p12), 1, %s733_s13  }
  0x16   : > { %184 = sbr.rel (%p181_p12) target bundleno = 377 (0x179), region = 32  ;;  %s544_s9 = sshll.u32 (!%p181_p12), %s186_s8, 3 }
  0x17   : > { %s187_s10 = scalar_lea.sflag (!%p181_p12), [#allocation4], %s186_s8  ;;  %s190_s11 = scalar_lea.vmem (!%p181_p12), [#allocation3], %s544_s9 }
  0x1b   : > { %720 = dma.done.wait (%p820_p7), %s187_s10, 128  }
  0x1c   : > { %722 = vsyncadd (%p820_p7), %s187_s10, 4294967168  ;;  %p219_p13 = scmp.lt.s32.totalorder %s741_s15, 1  ;;  %p227_p0 = scmp.eq.s32.totalorder %s741_s15, 0 }
  0x1d   : > { %v233_v0 = vlaneseq (%p227_p0)  ;;  %v751_v1 = vmov (%p227_p0), 0.0  }
  0x1e   : > { %s220_s12 = scalar_select %p219_p13, %s741_s15, 1 }
  0x1f   : > { %232 = sbr.rel (!%p227_p0) target bundleno = 36 (0x24), region = 40  ;;  %vm235_vm0 = vcmp.lt.s32.totalorder (%p227_p0), %v233_v0, 256 }
  0x20   : > { %s545_s20 = sshll.u32 %s220_s12, 1  ;;  %237 = vst.msk [vmem:[#allocation2] sm:$0x3] (%p227_p0), %vm235_vm0, %v751_v1 }
  0x21   : > { %s848_s25 = scalar_lea.vmem %s925_s1, %s545_s20 }
  0x24 PF: > { %v370_v2 = vld [vmem:[%s926_s2] sm:$0xf]  ;;  %v752_v3 = vmov 0   ;;  %p417_p1 = scmp.eq.s32.totalorder %s741_s15, 1  ;;  %v238_v4 = vld [vmem:[%s190_s11] sm:$0xff]  ;;  %vm261_vm1 = vcmask 1043456   ;;  %v296_v37 = vlaneseq }
  0x25   : > { %622 = vset.pattern.permute.xlu0 %v752_v3  ;;  %254 = vst [vmem:[#allocation1] ss:$2 sm:$0xff] %v238_v4  ;;  %v239_v38 = vld [vmem:[%s848_s25] sm:$0x3]  ;;  %vm408_vm12 = vcmask 1040384   ;;  %vm449_vm15 = vcmask (%p417_p1), 0  }
  0x26   : > { %373 = vperm.xlu0 %622, %v370_v2   ;;  %v297_v41 = vshrl.u32 %v296_v37, 7  ;;  %v299_v42 = vperm.slane %v239_v38, 1  ;;  %v298_v44 = vperm.slane %v239_v38, 0  ;;  %vm414_vm13 = vcmp.lt.s32.totalorder %v296_v37, 256 }
  0x27   : > { %v753_v37 = vmov (%p417_p1), 512.0  }
  0x28   : > { %vm860_vm2 = vcmp.eq.s32.totalorder %v297_v41, %v299_v42  ;;  %vm864_vm3 = vcmp.eq.s32.totalorder %v297_v41, %v298_v44 }
  0x2c   : > { %v255_v5 = vld.sshfl [vmem:[#allocation1] sm:$0xff pattern:$0x75316420]  ;;  %v256_v6 = vld.sshfl [vmem:[#allocation1 + $0x8] sm:$0xff pattern:$0x75316420] }
  0x2d   : > { %v262_v7 = vsel %vm261_vm1, %v255_v5, -inf  ;;  %v269_v8 = vsel %vm261_vm1, %v256_v6, -inf }
  0x2e   : > { %v263_v9 = vrot.slane %v262_v7, 4  ;;  %v270_v10 = vrot.slane %v269_v8, 4 }
  0x30   : > { %v264_v11 = vmax.f32 %v262_v7, %v263_v9  ;;  %v271_v12 = vmax.f32 %v269_v8, %v270_v10 }
  0x32   : > { %v265_v13 = vrot.slane %v264_v11, 2  ;;  %v272_v14 = vrot.slane %v271_v12, 2 }
  0x34   : > { %v266_v15 = vmax.f32 %v264_v11, %v265_v13  ;;  %v273_v16 = vmax.f32 %v271_v12, %v272_v14 }
  0x36   : > { %v267_v17 = vrot.slane %v266_v15, 1  ;;  %v274_v18 = vrot.slane %v273_v16, 1 }
  0x38   : > { %v268_v19 = vmax.f32 %v266_v15, %v267_v17  ;;  %v275_v20 = vmax.f32 %v273_v16, %v274_v18 }
  0x3a   : > { %v276_v21 = vsub.f32 %v255_v5, %v268_v19  ;;  %v277_v22 = vsub.f32 %v256_v6, %v275_v20 }
  0x3c   : > { %v278_v23 = vmul.f32 1.442695, %v276_v21  ;;  %v280_v24 = vmul.f32 1.442695, %v277_v22  ;;  %v302_v57 = vsel %vm864_vm3, %v276_v21, 0.0  ;;  %v303_v58 = vsel %vm860_vm2, %v277_v22, 0.0 }
  0x3d   : > { %v304_v61 = vsel %vm261_vm1, %v302_v57, 0.0  ;;  %v311_v0 = vsel %vm261_vm1, %v303_v58, 0.0 }
  0x3e   : > { %623 = vpow2.f32 %v278_v23  ;;  %v305_v3 = vrot.slane %v304_v61, 4  ;;  %v312_v4 = vrot.slane %v311_v0, 4 }
  0x3f   : > { %625 = vpow2.f32 %v280_v24 }
  0x40   : > { %v306_v9 = vadd.f32 %v305_v3, %v304_v61  ;;  %v313_v11 = vadd.f32 %v312_v4, %v311_v0 }
  0x42   : > { %v307_v20 = vrot.slane %v306_v9, 2  ;;  %v314_v23 = vrot.slane %v313_v11, 2 }
  0x44   : > { %v624_v25 = vpop.eup %623 }
  0x45   : > { %v626_v26 = vpop.eup %625  ;;  %v282_v27 = vsel %vm261_vm1, %v624_v25, 0.0  ;;  %v318_v49 = vsel %vm864_vm3, %v624_v25, 0.0 }
  0x46   : > { %v283_v28 = vrot.slane %v282_v27, 4  ;;  %v289_v29 = vsel %vm261_vm1, %v626_v26, 0.0  ;;  %v319_v48 = vsel %vm860_vm2, %v626_v26, 0.0  ;;  %v320_v52 = vsel %vm261_vm1, %v318_v49, 0.0 }
  0x47   : > { %v290_v30 = vrot.slane %v289_v29, 4  ;;  %v327_v50 = vsel %vm261_vm1, %v319_v48, 0.0  ;;  %v321_v55 = vrot.slane %v320_v52, 4 }
  0x48   : > { %v284_v31 = vadd.f32 %v283_v28, %v282_v27  ;;  %v328_v53 = vrot.slane %v327_v50, 4 }
  0x49   : > { %v291_v32 = vadd.f32 %v290_v30, %v289_v29  ;;  %v322_v62 = vadd.f32 %v321_v55, %v320_v52  ;;  %v308_v29 = vadd.f32 %v307_v20, %v306_v9  ;;  %v402_v9 = vld [vmem:[#allocation2] sm:$0x3] }
  0x4a   : > { %v285_v34 = vrot.slane %v284_v31, 2  ;;  %v329_v59 = vadd.f32 %v328_v53, %v327_v50 }
  0x4b   : > { %v292_v33 = vrot.slane %v291_v32, 2  ;;  %v323_v5 = vrot.slane %v322_v62, 2 }
  0x4c   : > { %v286_v36 = vadd.f32 %v285_v34, %v284_v31  ;;  %v330_v1 = vrot.slane %v329_v59, 2  ;;  %v315_v31 = vadd.f32 %v314_v23, %v313_v11 }
  0x4d   : > { %v293_v35 = vadd.f32 %v292_v33, %v291_v32  ;;  %v324_v12 = vadd.f32 %v323_v5, %v322_v62 }
  0x4e   : > { %v287_v40 = vrot.slane %v286_v36, 1  ;;  %v331_v7 = vadd.f32 %v330_v1, %v329_v59  ;;  %v316_v44 = vrot.slane %v315_v31, 1 }
  0x4f   : > { %v294_v39 = vrot.slane %v293_v35, 1  ;;  %v325_v24 = vrot.slane %v324_v12, 1 }
  0x50   : > { %v288_v45 = vadd.f32 %v287_v40, %v286_v36  ;;  %v332_v17 = vrot.slane %v331_v7, 1  ;;  %v309_v40 = vrot.slane %v308_v29, 1  ;;  %v317_v55 = vadd.f32 %v316_v44, %v315_v31 }
  0x51   : > { %v295_v43 = vadd.f32 %v294_v39, %v293_v35  ;;  %v326_v32 = vadd.f32 %v325_v24, %v324_v12 }
  0x52   : > { %vm345_vm6 = vweird.f32 %v288_v45  ;;  %v351_v15 = vand.u32 2147483648, %v288_v45  ;;  %v349_v19 = vand.u32 2147483647, %v288_v45  ;;  %v333_v27 = vadd.f32 %v332_v17, %v331_v7 }
  0x53   : > { %627 = vrcp.f32 %v295_v43  ;;  %vm360_vm4 = vweird.f32 %v295_v43  ;;  %v366_v10 = vand.u32 2147483648, %v295_v43  ;;  %v364_v14 = vand.u32 2147483647, %v295_v43 }
  0x54   : > { %629 = vrcp.f32 %v288_v45  ;;  %v352_v26 = vor.u32 1.1754944e-38, %v351_v15  ;;  %vm350_vm11 = vcmp.eq.f32.partialorder %v349_v19, 8.507059e+37  ;;  %v310_v53 = vadd.f32 %v309_v40, %v308_v29 }
  0x55   : > { %v367_v22 = vor.u32 1.1754944e-38, %v366_v10  ;;  %vm365_vm10 = vcmp.eq.f32.partialorder %v364_v14, 8.507059e+37  ;;  %631 = vlog2.f32 %v288_v45 }
  0x56   : > { %633 = vlog2.f32 %v295_v43 }
  0x57   : > { %635 = vrcp.f32 (%p417_p1), %v753_v37 }
  0x59   : > { %v628_v51 = vpop.eup %627 }
  0x5a   : > { %v630_v54 = vpop.eup %629  ;;  %v356_v56 = vmul.f32 %v628_v51, %v295_v43  ;;  %vm361_vm5 = vweird.f32 %v628_v51 }
  0x5b   : > { %v341_v60 = vmul.f32 %v630_v54, %v288_v45  ;;  %vm346_vm7 = vweird.f32 %v630_v54  ;;  %vm880_vm8 = vmor %vm360_vm4, %vm361_vm5  ;;  %v632_v39 = vpop.eup %631 }
  0x5c   : > { %v357_v63 = vsub.f32 1.0, %v356_v56  ;;  %vm884_vm9 = vmor %vm345_vm6, %vm346_vm7  ;;  %v634_v43 = vpop.eup %633  ;;  %v335_v47 = vmul.f32 0.6931472, %v632_v39 }
  0x5d   : > { %v342_v2 = vsub.f32 1.0, %v341_v60 }
  0x5e   : > { %v358_v6 = vmul.f32 %v628_v51, %v357_v63  ;;  %v338_v61 = vsub.f32 %v310_v53, %v335_v47 }
  0x5f   : > { %v343_v8 = vmul.f32 %v630_v54, %v342_v2 }
  0x60   : > { %v359_v13 = vadd.f32 %v628_v51, %v358_v6 }
  0x61   : > { %v344_v18 = vadd.f32 %v630_v54, %v343_v8 }
  0x62   : > { %v363_v25 = vsel %vm880_vm8, %v628_v51, %v359_v13 }
  0x63   : > { %v348_v28 = vsel %vm884_vm9, %v630_v54, %v344_v18  ;;  %v368_v30 = vsel %vm365_vm10, %v367_v22, %v363_v25  ;;  %v337_v54 = vmul.f32 0.6931472, %v634_v43 }
  0x64   : > { %v353_v34 = vsel %vm350_vm11, %v352_v26, %v348_v28  ;;  %v369_v35 = vmul.f32 %v368_v30, %v333_v27  ;;  %v636_v27 = vpop.eup (%p417_p1), %635 }
  0x65   : > { %v354_v45 = vmul.f32 %v353_v34, %v326_v32  ;;  %v339_v62 = vsub.f32 %v317_v55, %v337_v54  ;;  %v442_v28 = vmul.f32 (%p417_p1), 512.0, %v636_v27  ;;  %vm446_vm14 = vweird.f32 (%p417_p1), %v636_v27 }
  0x66   : > { %v395_v52 = vsub.f32 1.0, %v369_v35 }
  0x67   : > { %v394_v57 = vsub.f32 1.0, %v354_v45  ;;  %v443_v29 = vsub.f32 (%p417_p1), 1.0, %v442_v28 }
  0x68   : > { %v397_v60 = vmul.f32 %v395_v52, %v395_v52 }
  0x69   : > { %v396_v1 = vmul.f32 %v394_v57, %v394_v57  ;;  %v444_v30 = vmul.f32 (%p417_p1), %v636_v27, %v443_v29 }
  0x6a   : > { %v399_v4 = vsub.f32 0.0, %v397_v60 }
  0x6b   : > { %v398_v7 = vsub.f32 0.0, %v396_v1  ;;  %v445_v31 = vadd.f32 (%p417_p1), %v636_v27, %v444_v30 }
  0x6d   : > { %v447_v32 = vsel (%p417_p1), %vm446_vm14, %v636_v27, %v445_v31 }
  0x98   : > { %v374_v33 = vpop.permute.xlu0 %373 }
  0x99   : > { %v376_v36 = vsel %vm864_vm3, %v374_v33, 0.0  ;;  %v377_v38 = vsel %vm860_vm2, %v374_v33, 0.0 }
  0x9a   : > { %v378_v41 = vsel %vm261_vm1, %v376_v36, 0.0  ;;  %v385_v42 = vsel %vm261_vm1, %v377_v38, 0.0 }
  0x9b   : > { %v379_v48 = vrot.slane %v378_v41, 4  ;;  %v386_v49 = vrot.slane %v385_v42, 4 }
  0x9d   : > { %v380_v50 = vadd.f32 %v379_v48, %v378_v41  ;;  %v387_v51 = vadd.f32 %v386_v49, %v385_v42 }
  0x9f   : > { %v381_v46 = vrot.slane %v380_v50, 2  ;;  %v388_v56 = vrot.slane %v387_v51, 2 }
  0xa1   : > { %v382_v58 = vadd.f32 %v381_v46, %v380_v50  ;;  %v389_v59 = vadd.f32 %v388_v56, %v387_v51 }
  0xa3   : > { %v383_v63 = vrot.slane %v382_v58, 1  ;;  %v390_v0 = vrot.slane %v389_v59, 1 }
  0xa5   : > { %v384_v2 = vadd.f32 %v383_v63, %v382_v58  ;;  %v391_v3 = vadd.f32 %v390_v0, %v389_v59 }
  0xa7   : > { %v392_v5 = vmul.f32 %v384_v2, %v338_v61  ;;  %v393_v6 = vmul.f32 %v391_v3, %v339_v62 }
  0xa9   : > { %v401_v8 = vmul.f32 %v399_v4, %v393_v6  ;;  %v400_v10 = vmul.f32 %v398_v7, %v392_v5 }
  0xab   : > { %v407_v11 = vrot.slane %v401_v8, 7 }
  0xac   : > { %421 = sbr.rel (!%p417_p1) target bundleno = 371 (0x173), region = 44 }
  0xad   : > { %v409_v12 = vsel %vm408_vm12, %v400_v10, %v407_v11 }
  0xae   : > { %v411_v13 = vadd.f32 %v409_v12, %v402_v9 }
  0xb0   : > { %416 = vst.msk [vmem:[#allocation2] sm:$0x3] %vm414_vm13, %v411_v13 }
  0xb7   : > { %v422_v14 = vld [vmem:[#allocation2] sm:$0x3] }
  0xb8   : > { %v424_v15 = vperm.slane %v422_v14, 0  ;;  %v425_v16 = vperm.slane %v422_v14, 1 }
  0xba   : > { %v428_v17 = vsel %vm408_vm12, %v424_v15, 0.0  ;;  %v429_v18 = vsel %vm408_vm12, %v425_v16, 0.0 }
  0xbb   : > { %v430_v19 = vadd.f32 %v429_v18, %v428_v17 }
  0xbd   : > { %431 = vadd.xlane.f32.xlu0 %v430_v19 }
 0x130   : > { %v432_v20 = vpop.xlane.xlu0 %431 }
 0x131   : > { %v433_v21 = vrot.slane %v432_v20, 4 }
 0x133   : > { %v434_v22 = vadd.f32 %v433_v21, %v432_v20 }
 0x135   : > { %v435_v23 = vrot.slane %v434_v22, 2 }
 0x137   : > { %v436_v24 = vadd.f32 %v435_v23, %v434_v22 }
 0x139   : > { %v437_v25 = vrot.slane %v436_v24, 1 }
 0x13b   : > { %v438_v26 = vadd.f32 %v437_v25, %v436_v24 }
 0x13d   : > { %555 = vpush %v438_v26 }
 0x16e   : > { %s556_s15 = spop %555 }
 0x16f   : > { %v440_v33 = vstv %s556_s15 }
 0x170   : > { %v448_v34 = vmul.f32 %v447_v32, %v440_v33 }
 0x172   : > { %450 = vst.msk [vmem:[#allocation6] sm:$0x1] %vm449_vm15, %v448_v34 }
 0x173 PF: > { %p568_p2 = scmp.eq.s32.totalorder %s537_s18, 1  ;;  %s459_s29 = sshll.u32 %s927_s3, 4  ;;  %s460_s29 = int_to_ptr.hbm [resolvable:$true] %s459_s29 }
 0x174   : > { %s754_s30 = smov [#allocation6]  }
 0x175   : > { %s457_s4 = sshll.u32 %s754_s30, 4  ;;  %s458_s4 = int_to_ptr.vmem [resolvable:$true] %s457_s4 }
 0x176   : > { %560 = dma.vmem_to_hbm [thread:$0]  (%p568_p2), %s458_s4, 16, %s460_s29, [#allocation5]  }
 0x177   : > { %724 = dma.done.wait (%p568_p2), [#allocation5], 16  }
 0x178   : > { %726 = vsyncadd (%p568_p2), [#allocation5], 4294967280 }
 0x179 PF: > { %s17_s17 = sadd.s32 1, %s749_s17   ;;  %s938_s12 = smov %s733_s13 }
 0x17a   : > { %p14_p3 = scmp.ge.s32.totalorder %s17_s17, 4   ;;  %s939_s13 = smov %s737_s14 }
 0x17b   : > { %s940_s14 = smov %s826_s24  ;;  %s941_s15 = smov %s745_s16 }
 0x17c   : > { %s942_s16 = smov %s944_s19  ;;  %16 = sbr.rel (!%p14_p3) target bundleno = 5 (0x5), region = 80 }
 0x181   :  { %473 = vsyncpa [#allocation4], 1 }
 0x182   :  { %475 = vsyncpa [#allocation4 + $0x1], 1 }
 0x183   :  { %476 = vsyncpa [#allocation5], 1 }
 0x184   :  { %478 = vsyncpa [#allocation5 + $0x1], 1 }

</bundles_post_ra>
